<compile_context>
chip_gen: v7x
topology: tpu7x:2x2x1
jax: 0.10.0
libtpu: 0.0.40
codegen_flags: <defaults>
</compile_context>

<pallas_src>
import functools

import jax
import jax.numpy as jnp
from jax.experimental import pallas as pl
from jax.experimental.pallas import tpu as pltpu


def _round_up(x, m):
    return ((x + m - 1) // m) * m


def _upsample_kernel(x_ref, w_ref, shift_ref, o_ref):
    # x_ref:     (1, TH, W, Cin)           one H-slab of one image
    # w_ref:     (Cin, Cout)               1x1 conv weight with BN scale folded in
    # shift_ref: (1, Cout)                 conv bias + BN shift (f32)
    # o_ref:     (1, TH, 2, W, 2*Cout)     row-major identical to (1, 2*TH, 2*W, Cout)
    x = x_ref[0]                                        # (TH, W, Cin)
    th, w_dim, cin = x.shape
    cout = w_ref.shape[1]

    xm = x.reshape(th * w_dim, cin)
    y = jnp.dot(xm, w_ref[...], preferred_element_type=jnp.float32)   # (TH*W, Cout) f32
    y = y + shift_ref[...]                                            # folded bias + BN shift
    y = jnp.where(y > 0, y, 0.1 * y)                                  # LeakyReLU(0.1), f32 epilogue
    y = y.reshape(th, w_dim, cout).astype(o_ref.dtype)

    # Nearest-neighbor x2: out[2h+a, 2w+b, c] = y[h, w, c]
    # expressed as four plain duplicated stores into the (H, 2, W, 2*Cout) layout.
    for a in (0, 1):
        for b in (0, 1):
            o_ref[0, :, a, :, b * cout:(b + 1) * cout] = y


def _pick_tile_h(N, H, W, cin, cout, in_elem_bytes, out_elem_bytes,
                 budget_bytes=8 * 1024 * 1024):
    """Largest divisor TH of H whose double-buffered in+out blocks fit the budget."""
    best = 1
    for th in range(1, H + 1):
        if H % th:
            continue
        in_blk = th * W * cin * in_elem_bytes
        out_blk = th * 2 * W * 2 * cout * out_elem_bytes
        if 2 * (in_blk + out_blk) <= budget_bytes:   # x2 for double buffering
            best = th
    th = best
    # Give the pipeline / megacore a few grid steps even for small N.
    while N * (H // th) < 4 and th % 2 == 0 and th > 8:
        th //= 2
    return th


@functools.partial(jax.jit, static_argnames=("eps", "scale_factor", "io_dtype"))
def upsample_forward(x_nchw, conv_w, conv_b, gamma, beta, running_mean,
                     running_var, eps=1e-5, scale_factor=2,
                     io_dtype=jnp.float32):
    """x_nchw: (N, Cin, H, W).  Returns (N, Cout, sf*H, sf*W) in io_dtype."""
    assert scale_factor == 2, "kernel written for scale_factor=2"
    N, Cin, H, W = x_nchw.shape
    Cout = conv_w.shape[0]

    # ---- glue: NCHW -> NHWC; fold conv bias + eval-mode BN into (weight, shift) ----
    x = jnp.transpose(x_nchw, (0, 2, 3, 1)).astype(io_dtype)           # (N, H, W, Cin)
    bn_scale = gamma / jnp.sqrt(running_var + eps)                     # (Cout,)
    w = jnp.transpose(conv_w.reshape(Cout, Cin), (1, 0))               # (Cin, Cout)
    w_folded = w * bn_scale[None, :]                                   # BN scale -> weights
    shift = beta + bn_scale * (conv_b - running_mean)                  # (Cout,)

    # Lane-dense output channels: pad Cout to a multiple of 128 when cheap
    # (real YOLO Cout >= 128 -> no-op); tiny demo channels stay unpadded so the
    # padding bytes don't dominate the store-bound roofline.
    cout_p = _round_up(Cout, 128) if Cout >= 64 else _round_up(Cout, 8)
    if cout_p != Cout:
        w_folded = jnp.pad(w_folded, ((0, 0), (0, cout_p - Cout)))
        shift = jnp.pad(shift, (0, cout_p - Cout))
    w_folded = w_folded.astype(io_dtype)
    shift2d = shift.reshape(1, cout_p).astype(jnp.float32)             # f32 epilogue

    in_b = jnp.dtype(io_dtype).itemsize
    out_b = jnp.dtype(io_dtype).itemsize
    TH = _pick_tile_h(N, H, W, Cin, cout_p, in_b, out_b)

    out = pl.pallas_call(
        _upsample_kernel,
        out_shape=jax.ShapeDtypeStruct((N, H, 2, W, 2 * cout_p), io_dtype),
        grid_spec=pl.GridSpec(
            grid=(N, H // TH),
            in_specs=[
                pl.BlockSpec((1, TH, W, Cin), lambda n, t: (n, t, 0, 0)),
                pl.BlockSpec((Cin, cout_p), lambda n, t: (0, 0)),
                pl.BlockSpec((1, cout_p), lambda n, t: (0, 0)),
            ],
            out_specs=pl.BlockSpec((1, TH, 2, W, 2 * cout_p),
                                   lambda n, t: (n, t, 0, 0, 0)),
        ),
        compiler_params=pltpu.CompilerParams(
            dimension_semantics=("parallel", "parallel"),
            vmem_limit_bytes=32 * 1024 * 1024),
    )(x, w_folded, shift2d)

    # (N, H, 2, W, 2*Cout_p) is row-major identical to (N, 2H, 2W, Cout_p):
    # the reshape is free; then drop channel padding and go back to NCHW.
    out = out.reshape(N, 2 * H, 2 * W, cout_p)[..., :Cout]
    return jnp.transpose(out, (0, 3, 1, 2))


def _reference(x_nchw, conv_w, conv_b, gamma, beta, running_mean, running_var,
               eps=1e-5):
    # pure-JAX reference: 1x1 conv + eval BN + LeakyReLU(0.1) + nearest x2
    N, Cin, H, W = x_nchw.shape
    Cout = conv_w.shape[0]
    y = jnp.einsum('nchw,oc->nohw', x_nchw, conv_w.reshape(Cout, Cin))
    y = y + conv_b[None, :, None, None]
    y = (y - running_mean[None, :, None, None]) / jnp.sqrt(
        running_var[None, :, None, None] + eps)
    y = y * gamma[None, :, None, None] + beta[None, :, None, None]
    y = jnp.where(y > 0, y, 0.1 * y)
    y = jnp.repeat(jnp.repeat(y, 2, axis=2), 2, axis=3)
    return y


if __name__ == "__main__":
    key = jax.random.PRNGKey(0)
    N, Cin, Cout, H, W = 2, 4, 8, 16, 16

    k = jax.random.split(key, 7)
    x = jax.random.normal(k[0], (N, Cin, H, W), dtype=jnp.float32)
    conv_w = jax.random.normal(k[1], (Cout, Cin, 1, 1), dtype=jnp.float32) * 0.1
    conv_b = jax.random.normal(k[2], (Cout,), dtype=jnp.float32) * 0.1
    gamma = 1.0 + 0.1 * jax.random.normal(k[3], (Cout,), dtype=jnp.float32)
    beta = 0.1 * jax.random.normal(k[4], (Cout,), dtype=jnp.float32)
    running_mean = 0.1 * jax.random.normal(k[5], (Cout,), dtype=jnp.float32)
    running_var = jnp.abs(jax.random.normal(k[6], (Cout,), dtype=jnp.float32)) + 0.5

    ref = _reference(x, conv_w, conv_b, gamma, beta, running_mean, running_var)

    # f32 path (exact semantics)
    out = upsample_forward(x, conv_w, conv_b, gamma, beta,
                           running_mean, running_var)
    out = jax.block_until_ready(out)
    assert out.shape == (N, Cout, 2 * H, 2 * W), out.shape
    assert jnp.allclose(out, ref, atol=1e-4, rtol=1e-4), float(
        jnp.max(jnp.abs(out - ref)))

    # bf16 I/O path (mem-bound perf path on v6e/v7x), f32 accumulate + epilogue
    out_bf16 = upsample_forward(x, conv_w, conv_b, gamma, beta,
                                running_mean, running_var,
                                io_dtype=jnp.bfloat16)
    out_bf16 = jax.block_until_ready(out_bf16)
    assert out_bf16.shape == (N, Cout, 2 * H, 2 * W), out_bf16.shape
    assert jnp.allclose(out_bf16.astype(jnp.float32), ref,
                        atol=5e-2, rtol=5e-2), float(
        jnp.max(jnp.abs(out_bf16.astype(jnp.float32) - ref)))

    print("KERNEL_OK")
</pallas_src>

<mosaic_0001>
module attributes {stable_mosaic.version = 11 : i64} {
  func.func @_upsample_kernel(%arg0: i32, %arg1: i32, %arg2: memref<1x8x16x4xf32, #tpu.memory_space<vmem>>, %arg3: memref<4x8xf32, #tpu.memory_space<vmem>>, %arg4: memref<1x8xf32, #tpu.memory_space<vmem>>, %arg5: memref<1x8x2x16x16xf32, #tpu.memory_space<vmem>>) attributes {dimension_semantics = [#tpu.dimension_semantics<parallel>, #tpu.dimension_semantics<parallel>], iteration_bounds = array<i64: 2, 2>, scalar_prefetch = 0 : i64, scratch_operands = 0 : i64, tpu.core_type = #tpu.core_type<tc>, window_params = [{transform_indices = @transform_0, window_bounds = array<i64: 1, 8, 16, 4>}, {pipeline_mode = #tpu.pipeline_mode<synchronous>, transform_indices = @transform_1, window_bounds = array<i64: 4, 8>}, {pipeline_mode = #tpu.pipeline_mode<synchronous>, transform_indices = @transform_2, window_bounds = array<i64: 1, 8>}, {transform_indices = @transform_3, window_bounds = array<i64: 1, 8, 2, 16, 16>}]} {
    %c0 = arith.constant 0 : index
    %c0_0 = arith.constant 0 : index
    %c0_1 = arith.constant 0 : index
    %c0_2 = arith.constant 0 : index
    %0 = vector.load %arg2[%c0, %c0_0, %c0_1, %c0_2] : memref<1x8x16x4xf32, #tpu.memory_space<vmem>>, vector<1x8x16x4xf32>
    %1 = vector.shape_cast %0 : vector<1x8x16x4xf32> to vector<8x16x4xf32>
    %2 = vector.shape_cast %1 : vector<8x16x4xf32> to vector<128x4xf32>
    %c0_3 = arith.constant 0 : index
    %c0_4 = arith.constant 0 : index
    %3 = vector.load %arg3[%c0_3, %c0_4] : memref<4x8xf32, #tpu.memory_space<vmem>>, vector<4x8xf32>
    %cst = arith.constant dense<0.000000e+00> : vector<128x8xf32>
    %4 = tpu.matmul %2, %3, %cst {dimension_numbers = #tpu.dot_dimension_numbers<[1], [0], [0], [1], [0, 0, 1, 1], [], []>} : vector<128x4xf32>, vector<4x8xf32>, vector<128x8xf32> -> vector<128x8xf32>
    %c0_5 = arith.constant 0 : index
    %c0_6 = arith.constant 0 : index
    %5 = vector.load %arg4[%c0_5, %c0_6] : memref<1x8xf32, #tpu.memory_space<vmem>>, vector<1x8xf32>
    %6 = vector.broadcast %5 : vector<1x8xf32> to vector<128x8xf32>
    %7 = arith.addf %4, %6 : vector<128x8xf32>
    %cst_7 = arith.constant 0.000000e+00 : f32
    %8 = vector.broadcast %cst_7 : f32 to vector<128x8xf32>
    %9 = arith.cmpf ogt, %7, %8 : vector<128x8xf32>
    %cst_8 = arith.constant 1.000000e-01 : f32
    %10 = vector.broadcast %cst_8 : f32 to vector<128x8xf32>
    %11 = arith.mulf %10, %7 : vector<128x8xf32>
    %12 = arith.select %9, %7, %11 : vector<128x8xi1>, vector<128x8xf32>
    %13 = vector.shape_cast %12 : vector<128x8xf32> to vector<8x16x8xf32>
    %c0_9 = arith.constant 0 : index
    %c0_10 = arith.constant 0 : index
    %c0_11 = arith.constant 0 : index
    %c0_12 = arith.constant 0 : index
    %c0_13 = arith.constant 0 : index
    %14 = vector.load %arg5[%c0_9, %c0_10, %c0_11, %c0_12, %c0_13] : memref<1x8x2x16x16xf32, #tpu.memory_space<vmem>>, vector<1x8x1x16x8xf32>
    %15 = vector.shape_cast %14 : vector<1x8x1x16x8xf32> to vector<8x16x8xf32>
    %16 = vector.shape_cast %13 : vector<8x16x8xf32> to vector<1x8x1x16x8xf32>
    tpu.vector_store %arg5[%c0_9, %c0_10, %c0_11, %c0_12, %c0_13], %16 {strides = array<i32>} : memref<1x8x2x16x16xf32, #tpu.memory_space<vmem>>, vector<1x8x1x16x8xf32>,
    %c0_14 = arith.constant 0 : index
    %c0_15 = arith.constant 0 : index
    %c0_16 = arith.constant 0 : index
    %c0_17 = arith.constant 0 : index
    %c8 = arith.constant 8 : index
    %17 = vector.load %arg5[%c0_14, %c0_15, %c0_16, %c0_17, %c8] : memref<1x8x2x16x16xf32, #tpu.memory_space<vmem>>, vector<1x8x1x16x8xf32>
    %18 = vector.shape_cast %17 : vector<1x8x1x16x8xf32> to vector<8x16x8xf32>
    %19 = vector.shape_cast %13 : vector<8x16x8xf32> to vector<1x8x1x16x8xf32>
    tpu.vector_store %arg5[%c0_14, %c0_15, %c0_16, %c0_17, %c8], %19 {strides = array<i32>} : memref<1x8x2x16x16xf32, #tpu.memory_space<vmem>>, vector<1x8x1x16x8xf32>,
    %c0_18 = arith.constant 0 : index
    %c0_19 = arith.constant 0 : index
    %c1 = arith.constant 1 : index
    %c0_20 = arith.constant 0 : index
    %c0_21 = arith.constant 0 : index
    %20 = vector.load %arg5[%c0_18, %c0_19, %c1, %c0_20, %c0_21] : memref<1x8x2x16x16xf32, #tpu.memory_space<vmem>>, vector<1x8x1x16x8xf32>
    %21 = vector.shape_cast %20 : vector<1x8x1x16x8xf32> to vector<8x16x8xf32>
    %22 = vector.shape_cast %13 : vector<8x16x8xf32> to vector<1x8x1x16x8xf32>
    tpu.vector_store %arg5[%c0_18, %c0_19, %c1, %c0_20, %c0_21], %22 {strides = array<i32>} : memref<1x8x2x16x16xf32, #tpu.memory_space<vmem>>, vector<1x8x1x16x8xf32>,
    %c0_22 = arith.constant 0 : index
    %c0_23 = arith.constant 0 : index
    %c1_24 = arith.constant 1 : index
    %c0_25 = arith.constant 0 : index
    %c8_26 = arith.constant 8 : index
    %23 = vector.load %arg5[%c0_22, %c0_23, %c1_24, %c0_25, %c8_26] : memref<1x8x2x16x16xf32, #tpu.memory_space<vmem>>, vector<1x8x1x16x8xf32>
    %24 = vector.shape_cast %23 : vector<1x8x1x16x8xf32> to vector<8x16x8xf32>
    %25 = vector.shape_cast %13 : vector<8x16x8xf32> to vector<1x8x1x16x8xf32>
    tpu.vector_store %arg5[%c0_22, %c0_23, %c1_24, %c0_25, %c8_26], %25 {strides = array<i32>} : memref<1x8x2x16x16xf32, #tpu.memory_space<vmem>>, vector<1x8x1x16x8xf32>,
    return
  }
  func.func @transform_0(%arg0: i32, %arg1: i32) -> (i32, i32, i32, i32) {
    %c0_i32 = arith.constant 0 : i32
    %c0_i32_0 = arith.constant 0 : i32
    %c0_i32_1 = arith.constant 0 : i32
    return %arg0, %arg1, %c0_i32, %c0_i32_0 : i32, i32, i32, i32
  }
  func.func @transform_1(%arg0: i32, %arg1: i32) -> (i32, i32) {
    %c0_i32 = arith.constant 0 : i32
    %c0_i32_0 = arith.constant 0 : i32
    %c0_i32_1 = arith.constant 0 : i32
    return %c0_i32, %c0_i32_0 : i32, i32
  }
  func.func @transform_2(%arg0: i32, %arg1: i32) -> (i32, i32) {
    %c0_i32 = arith.constant 0 : i32
    %c0_i32_0 = arith.constant 0 : i32
    %c0_i32_1 = arith.constant 0 : i32
    return %c0_i32, %c0_i32_0 : i32, i32
  }
  func.func @transform_3(%arg0: i32, %arg1: i32) -> (i32, i32, i32, i32, i32) {
    %c0_i32 = arith.constant 0 : i32
    %c0_i32_0 = arith.constant 0 : i32
    %c0_i32_1 = arith.constant 0 : i32
    %c0_i32_2 = arith.constant 0 : i32
    return %arg0, %arg1, %c0_i32, %c0_i32_0, %c0_i32_1 : i32, i32, i32, i32, i32
  }
}

</mosaic_0001>

<bundles_post_ra>
// kernel: upsample_forward.1
= control target key start
LH: loop header
LB: loop body
LE: loop exit
PB: predicated region body
PF: predicated region fallthrough
CT: control target
= control target key end

     0   :  { %s927_s12 = smov 0   ;;  %s929_s13 = smov 0   ;;  %s1167_s0 = inlined_call_operand.vmem [shape: f32[2,16,16,4], index: 0, kind: input, shape index: {}]   ;;  %s1168_s1 = inlined_call_operand.vmem [shape: f32[4,8], index: 1, kind: input, shape index: {}]   ;;  %s1169_s2 = inlined_call_operand.vmem [shape: f32[1,8], index: 2, kind: input, shape index: {}]   ;;  %s1170_s3 = inlined_call_operand.vmem [shape: f32[2,16,2,16,16], index: 3, kind: output, shape index: {}]  }
   0x1   :  { %s931_s14 = smov 0   ;;  %s933_s15 = smov 0  }
   0x2   :  { %s935_s16 = smov 0  }
   0x3 LB: > { %s22_s17 = sadd.s32 1, %s896_s14  ;;  %s25_s18 = sadd.s32 1, %s900_s15  ;;  %s904_s16 = sphi %s935_s16, %s13_s16   ;;  %s900_s15 = sphi %s933_s15, %s1174_s15   ;;  %s896_s14 = sphi %s931_s14, %s1173_s14   ;;  %s892_s13 = sphi %s929_s13, %s1172_s13   ;;  %s888_s12 = sphi %s927_s12, %s1171_s12  }
   0x4   : > { %p23_p0 = scmp.ge.s32.totalorder %s22_s17, 2  ;;  %p719_p1 = scmp.ge.s32.totalorder %s904_s16, 1 }
   0x5   : > { %p159_p2 = scmp.lt.s32.totalorder %s904_s16, 5 }
   0x6   : > { %s1176_s17 = smov (%p23_p0, %s22_s17), 0  ;;  %s1178_s18 = smov (!%p23_p0, %s25_s18), %s900_s15 }
   0x7   : > { %p160_p3 = pnand %p719_p1, %p159_p2  ;;  %p27_p4 = scmp.ge.s32.totalorder %s1178_s18, 2 }
   0x8   : > { %v231_v0 = vld [vmem:[%s1168_s1] sm:$0xf] (!%p160_p3)  ;;  %vm288_vm0 = vcmask (!%p160_p3), 1043456   ;;  %s720_s21 = sshll.u32 (!%p160_p3), %s888_s12, 3  ;;  %p194_p5 = scmp.lt.s32.totalorder (!%p160_p3), %s892_s13, 1  ;;  %vm239_vm1 = vcmask (!%p160_p3), 31744  }
   0x9   : > { %s1180_s18 = smov (%p27_p4, %s1178_s18), 0  ;;  %163 = sbr.rel (%p160_p3) target bundleno = 386 (0x182), region = 32 }
   0xa   : > { %797 = vmatprep.subr.msk.mxu0 (!%p160_p3), %vm288_vm0, %v231_v0  ;;  %823 = vmatprep.subr.msk.mxu1 (!%p160_p3), %vm288_vm0, %v231_v0  ;;  %p196_p6 = scmp.lt.s32.totalorder (!%p160_p3), %s720_s21, 15  ;;  %v984_v17 = vld [vmem:[%s1169_s2] ss:$0 sm:$0xff] (!%p160_p3)  ;;  %vm485_vm2 = vcmask (!%p160_p3), 64512   ;;  %s906_s11 = smov (!%p160_p3), 8  }
   0xb   : > { %798 = vmatpush3.msk.msra.mxu0 (!%p160_p3), %vm288_vm0, %v231_v0  ;;  %824 = vmatpush3.msk.msra.mxu1 (!%p160_p3), %vm288_vm0, %v231_v0 }
  0x10   : > { %s1182_s13 = smov (!%p194_p5, %s892_s13), 1  ;;  %s1184_s21 = smov (!%p196_p6, %s720_s21), 15 }
  0x11   : > { %s722_s22 = sshll.u32 %s1182_s13, 5  ;;  %s726_s23 = sshll.u32 %s1182_s13, 6 }
  0x12   : > { %s721_s24 = sshll.u32 %s1184_s21, 1  ;;  %s725_s25 = sshll.u32 %s1184_s21, 2 }
  0x13   : > { %s200_s26 = sadd.s32 %s722_s22, %s721_s24  ;;  %s960_s27 = sadd.s32 %s726_s23, %s725_s25 }
  0x14   : > { %s723_s28 = sshll.u32 %s200_s26, 3  ;;  %s727_s7 = sshll.u32 %s960_s27, 3 }
  0x15   : > { %s202_s4 = scalar_lea.vmem %s1167_s0, %s723_s28  ;;  %s994_s10 = scalar_lea.vmem %s1170_s3, %s727_s7 }
  0x16   : > { %v215_v1 = vld [vmem:[%s202_s4] sm:$0xff]  ;;  %v216_v3 = vld [vmem:[%s202_s4 + $0x8] sm:$0xff]  ;;  %v217_v5 = vld [vmem:[%s202_s4 + $0x10] sm:$0xff] }
  0x17   : > { %v223_v2 = vld [vmem:[%s202_s4 + $0x40] sm:$0xff]  ;;  %799 = vmatprep.mubr.msk.f32.mxu0 %vm239_vm1, %v215_v1  ;;  %v224_v4 = vld [vmem:[%s202_s4 + $0x48] sm:$0xff]  ;;  %v225_v6 = vld [vmem:[%s202_s4 + $0x50] sm:$0xff] }
  0x18   : > { %811 = vmatprep.mubr.msk.f32.mxu1 %vm239_vm1, %v223_v2  ;;  %800 = vmatmul.mubr.msk.f32.vlgmr.msra.gmra.mrb[0].mxu0 %vm239_vm1, %v216_v3  ;;  %v218_v7 = vld [vmem:[%s202_s4 + $0x18] sm:$0xff]  ;;  %v219_v9 = vld [vmem:[%s202_s4 + $0x20] sm:$0xff]  ;;  %v220_v11 = vld [vmem:[%s202_s4 + $0x28] sm:$0xff] }
  0x19   : > { %812 = vmatmul.mubr.msk.f32.vlgmr.msra.gmra.mrb[0].mxu1 %vm239_vm1, %v224_v4  ;;  %802 = vmatprep.mubr.msk.f32.mxu0 %vm239_vm1, %v217_v5  ;;  %v226_v8 = vld [vmem:[%s202_s4 + $0x58] sm:$0xff]  ;;  %v227_v10 = vld [vmem:[%s202_s4 + $0x60] sm:$0xff]  ;;  %v228_v12 = vld [vmem:[%s202_s4 + $0x68] sm:$0xff] }
  0x1a   : > { %814 = vmatprep.mubr.msk.f32.mxu1 %vm239_vm1, %v225_v6  ;;  %v221_v13 = vld [vmem:[%s202_s4 + $0x30] sm:$0xff]  ;;  %v222_v15 = vld [vmem:[%s202_s4 + $0x38] sm:$0xff] }
  0x1b   : > { %v229_v14 = vld [vmem:[%s202_s4 + $0x70] sm:$0xff]  ;;  %v230_v16 = vld [vmem:[%s202_s4 + $0x78] sm:$0xff] }
  0x1c   : > { %803 = vmatmul.mubr.msk.f32.gmra.mrb[2].mxu0 %vm239_vm1, %v218_v7 }
  0x1d   : > { %815 = vmatmul.mubr.msk.f32.gmra.mrb[2].mxu1 %vm239_vm1, %v226_v8  ;;  %805 = vmatprep.mubr.msk.f32.mxu0 %vm239_vm1, %v219_v9 }
  0x1e   : > { %817 = vmatprep.mubr.msk.f32.mxu1 %vm239_vm1, %v227_v10 }
  0x20   : > { %806 = vmatmul.mubr.msk.f32.gmra.mrb[4].mxu0 %vm239_vm1, %v220_v11 }
  0x21   : > { %818 = vmatmul.mubr.msk.f32.gmra.mrb[4].mxu1 %vm239_vm1, %v228_v12  ;;  %808 = vmatprep.mubr.msk.f32.mxu0 %vm239_vm1, %v221_v13 }
  0x22   : > { %820 = vmatprep.mubr.msk.f32.mxu1 %vm239_vm1, %v229_v14 }
  0x24   : > { %809 = vmatmul.mubr.msk.f32.gmra.mrb[6].mxu0 %vm239_vm1, %v222_v15 }
  0x25   : > { %821 = vmatmul.mubr.msk.f32.gmra.mrb[6].mxu1 %vm239_vm1, %v230_v16 }
  0xeb   : > { %v801_v18 = vpop.f32.mrb[0].mxu0 }
  0xec   : > { %v813_v19 = vpop.f32.mrb[0].mxu1  ;;  %v364_v20 = vadd.f32 %v801_v18, %v984_v17  ;;  %v358_v22 = vpop.f32.mrb[1].mxu0 }
  0xed   : > { %v404_v21 = vadd.f32 %v813_v19, %v984_v17  ;;  %v398_v23 = vpop.f32.mrb[1].mxu1  ;;  %v359_v24 = vadd.f32 %v984_v17, %v358_v22 }
  0xee   : > { %v399_v25 = vadd.f32 %v984_v17, %v398_v23  ;;  %v454_v26 = vmul.f32 0.1, %v364_v20  ;;  %vm438_vm4 = vcmp.gt.f32.partialorder %v364_v20, 0.0 }
  0xef   : > { %v462_v27 = vmul.f32 0.1, %v404_v21  ;;  %vm446_vm3 = vcmp.gt.f32.partialorder %v404_v21, 0.0  ;;  %v453_v28 = vmul.f32 0.1, %v359_v24  ;;  %v804_v30 = vpop.f32.mrb[2].mxu0 }
  0xf0   : > { %v461_v29 = vmul.f32 0.1, %v399_v25  ;;  %v816_v31 = vpop.f32.mrb[2].mxu1  ;;  %v374_v32 = vadd.f32 %v804_v30, %v984_v17  ;;  %v368_v33 = vpop.f32.mrb[3].mxu0  ;;  %v470_v37 = vsel %vm438_vm4, %v364_v20, %v454_v26  ;;  %vm437_vm5 = vcmp.gt.f32.partialorder %v359_v24, 0.0 }
  0xf1   : > { %v414_v34 = vadd.f32 %v816_v31, %v984_v17  ;;  %v478_v35 = vsel %vm446_vm3, %v404_v21, %v462_v27  ;;  %v408_v36 = vpop.f32.mrb[3].mxu1  ;;  %v369_v38 = vadd.f32 %v984_v17, %v368_v33  ;;  %520 = vrot.lane.b32.xlu0 %v470_v37, %s906_s11  ;;  %487 = vst.msk [vmem:[%s994_s10 + $0x8] sm:$0xff] %vm485_vm2, %v470_v37  ;;  %747 = vst.msk [vmem:[%s994_s10 + $0x18] sm:$0xff] %vm485_vm2, %v470_v37 }
  0xf2   : > { %536 = vrot.lane.b32.xlu1 %v478_v35, %s906_s11  ;;  %495 = vst.msk [vmem:[%s994_s10 + $0x88] sm:$0xff] %vm485_vm2, %v478_v35  ;;  %755 = vst.msk [vmem:[%s994_s10 + $0x98] sm:$0xff] %vm485_vm2, %v478_v35  ;;  %v409_v39 = vadd.f32 %v984_v17, %v408_v36  ;;  %vm445_vm6 = vcmp.gt.f32.partialorder %v399_v25, 0.0  ;;  %v456_v40 = vmul.f32 0.1, %v374_v32  ;;  %vm440_vm7 = vcmp.gt.f32.partialorder %v374_v32, 0.0 }
  0xf3   : > { %v464_v41 = vmul.f32 0.1, %v414_v34  ;;  %v469_v42 = vsel %vm437_vm5, %v359_v24, %v453_v28  ;;  %v455_v43 = vmul.f32 0.1, %v369_v38  ;;  %v807_v45 = vpop.f32.mrb[4].mxu0  ;;  %vm448_vm8 = vcmp.gt.f32.partialorder %v414_v34, 0.0 }
  0xf4   : > { %v463_v44 = vmul.f32 0.1, %v409_v39  ;;  %486 = vst.msk [vmem:[%s994_s10] sm:$0xff] %vm485_vm2, %v469_v42  ;;  %746 = vst.msk [vmem:[%s994_s10 + $0x10] sm:$0xff] %vm485_vm2, %v469_v42  ;;  %v477_v46 = vsel %vm445_vm6, %v399_v25, %v461_v29  ;;  %v472_v47 = vsel %vm440_vm7, %v374_v32, %v456_v40  ;;  %v384_v48 = vadd.f32 %v807_v45, %v984_v17  ;;  %v378_v49 = vpop.f32.mrb[5].mxu0  ;;  %v819_v51 = vpop.f32.mrb[4].mxu1 }
  0xf5   : > { %v480_v50 = vsel %vm448_vm8, %v414_v34, %v464_v41  ;;  %494 = vst.msk [vmem:[%s994_s10 + $0x80] sm:$0xff] %vm485_vm2, %v477_v46  ;;  %754 = vst.msk [vmem:[%s994_s10 + $0x90] sm:$0xff] %vm485_vm2, %v477_v46  ;;  %vm439_vm9 = vcmp.gt.f32.partialorder %v369_v38, 0.0  ;;  %518 = vrot.lane.b32.xlu0 %v469_v42, %s906_s11  ;;  %v379_v52 = vadd.f32 %v984_v17, %v378_v49  ;;  %v418_v54 = vpop.f32.mrb[5].mxu1  ;;  %vm447_vm10 = vcmp.gt.f32.partialorder %v409_v39, 0.0 }
  0xf6   : > { %524 = vrot.lane.b32.xlu1 %v472_v47, %s906_s11  ;;  %489 = vst.msk [vmem:[%s994_s10 + $0x28] sm:$0xff] %vm485_vm2, %v472_v47  ;;  %749 = vst.msk [vmem:[%s994_s10 + $0x38] sm:$0xff] %vm485_vm2, %v472_v47  ;;  %v424_v53 = vadd.f32 %v819_v51, %v984_v17  ;;  %v471_v55 = vsel %vm439_vm9, %v369_v38, %v455_v43  ;;  %v458_v56 = vmul.f32 0.1, %v384_v48  ;;  %vm442_vm11 = vcmp.gt.f32.partialorder %v384_v48, 0.0 }
  0xf7   : > { %497 = vst.msk [vmem:[%s994_s10 + $0xa8] sm:$0xff] %vm485_vm2, %v480_v50  ;;  %757 = vst.msk [vmem:[%s994_s10 + $0xb8] sm:$0xff] %vm485_vm2, %v480_v50  ;;  %v419_v57 = vadd.f32 %v984_v17, %v418_v54  ;;  %v479_v58 = vsel %vm447_vm10, %v409_v39, %v463_v44  ;;  %v457_v59 = vmul.f32 0.1, %v379_v52  ;;  %v810_v61 = vpop.f32.mrb[6].mxu0  ;;  %vm441_vm12 = vcmp.gt.f32.partialorder %v379_v52, 0.0 }
  0xf8   : > { %488 = vst.msk [vmem:[%s994_s10 + $0x20] sm:$0xff] %vm485_vm2, %v471_v55  ;;  %748 = vst.msk [vmem:[%s994_s10 + $0x30] sm:$0xff] %vm485_vm2, %v471_v55  ;;  %v466_v60 = vmul.f32 0.1, %v424_v53  ;;  %v394_v63 = vadd.f32 %v810_v61, %v984_v17  ;;  %v388_v0 = vpop.f32.mrb[7].mxu0  ;;  %v474_v1 = vsel %vm442_vm11, %v384_v48, %v458_v56  ;;  %v822_v2 = vpop.f32.mrb[6].mxu1 }
  0xf9   : > { %496 = vst.msk [vmem:[%s994_s10 + $0xa0] sm:$0xff] %vm485_vm2, %v479_v58  ;;  %756 = vst.msk [vmem:[%s994_s10 + $0xb0] sm:$0xff] %vm485_vm2, %v479_v58  ;;  %v465_v62 = vmul.f32 0.1, %v419_v57  ;;  %vm450_vm13 = vcmp.gt.f32.partialorder %v424_v53, 0.0  ;;  %534 = vrot.lane.b32.xlu0 %v477_v46, %s906_s11  ;;  %v389_v3 = vadd.f32 %v984_v17, %v388_v0  ;;  %v473_v4 = vsel %vm441_vm12, %v379_v52, %v457_v59  ;;  %v428_v6 = vpop.f32.mrb[7].mxu1 }
  0xfa   : > { %540 = vrot.lane.b32.xlu1 %v480_v50, %s906_s11  ;;  %491 = vst.msk [vmem:[%s994_s10 + $0x48] sm:$0xff] %vm485_vm2, %v474_v1  ;;  %751 = vst.msk [vmem:[%s994_s10 + $0x58] sm:$0xff] %vm485_vm2, %v474_v1  ;;  %v434_v5 = vadd.f32 %v822_v2, %v984_v17  ;;  %vm449_vm14 = vcmp.gt.f32.partialorder %v419_v57, 0.0  ;;  %v460_v7 = vmul.f32 0.1, %v394_v63  ;;  %v429_v8 = vadd.f32 %v984_v17, %v428_v6 }
  0xfb   : > { %490 = vst.msk [vmem:[%s994_s10 + $0x40] sm:$0xff] %vm485_vm2, %v473_v4  ;;  %750 = vst.msk [vmem:[%s994_s10 + $0x50] sm:$0xff] %vm485_vm2, %v473_v4  ;;  %v482_v9 = vsel %vm450_vm13, %v424_v53, %v466_v60  ;;  %v481_v10 = vsel %vm449_vm14, %v419_v57, %v465_v62  ;;  %v459_v11 = vmul.f32 0.1, %v389_v3  ;;  %vm444_vm15 = vcmp.gt.f32.partialorder %v394_v63, 0.0 }
  0xfc   : > { %v468_v12 = vmul.f32 0.1, %v434_v5  ;;  %499 = vst.msk [vmem:[%s994_s10 + $0xc8] sm:$0xff] %vm485_vm2, %v482_v9  ;;  %759 = vst.msk [vmem:[%s994_s10 + $0xd8] sm:$0xff] %vm485_vm2, %v482_v9  ;;  %vm443_vm0 = vcmp.gt.f32.partialorder %v389_v3, 0.0  ;;  %v476_v14 = vsel %vm444_vm15, %v394_v63, %v460_v7  ;;  %vm452_vm1 = vcmp.gt.f32.partialorder %v434_v5, 0.0 }
  0xfd   : > { %498 = vst.msk [vmem:[%s994_s10 + $0xc0] sm:$0xff] %vm485_vm2, %v481_v10  ;;  %758 = vst.msk [vmem:[%s994_s10 + $0xd0] sm:$0xff] %vm485_vm2, %v481_v10  ;;  %v467_v13 = vmul.f32 0.1, %v429_v8  ;;  %vm451_vm3 = vcmp.gt.f32.partialorder %v429_v8, 0.0  ;;  %538 = vrot.lane.b32.xlu0 %v479_v58, %s906_s11  ;;  %v475_v15 = vsel %vm443_vm0, %v389_v3, %v459_v11 }
  0xfe   : > { %522 = vrot.lane.b32.xlu1 %v471_v55, %s906_s11  ;;  %493 = vst.msk [vmem:[%s994_s10 + $0x68] sm:$0xff] %vm485_vm2, %v476_v14  ;;  %753 = vst.msk [vmem:[%s994_s10 + $0x78] sm:$0xff] %vm485_vm2, %v476_v14  ;;  %v484_v16 = vsel %vm452_vm1, %v434_v5, %v468_v12 }
  0xff   : > { %492 = vst.msk [vmem:[%s994_s10 + $0x60] sm:$0xff] %vm485_vm2, %v475_v15  ;;  %752 = vst.msk [vmem:[%s994_s10 + $0x70] sm:$0xff] %vm485_vm2, %v475_v15  ;;  %v483_v17 = vsel %vm451_vm3, %v429_v8, %v467_v13 }
 0x100   : > { %501 = vst.msk [vmem:[%s994_s10 + $0xe8] sm:$0xff] %vm485_vm2, %v484_v16  ;;  %761 = vst.msk [vmem:[%s994_s10 + $0xf8] sm:$0xff] %vm485_vm2, %v484_v16 }
 0x101   : > { %500 = vst.msk [vmem:[%s994_s10 + $0xe0] sm:$0xff] %vm485_vm2, %v483_v17  ;;  %760 = vst.msk [vmem:[%s994_s10 + $0xf0] sm:$0xff] %vm485_vm2, %v483_v17  ;;  %526 = vrot.lane.b32.xlu0 %v473_v4, %s906_s11  ;;  %vm566_vm2 = vcmask 130112  }
 0x102   : > { %528 = vrot.lane.b32.xlu1 %v474_v1, %s906_s11 }
 0x105   : > { %542 = vrot.lane.b32.xlu0 %v481_v10, %s906_s11 }
 0x106   : > { %544 = vrot.lane.b32.xlu1 %v482_v9, %s906_s11 }
 0x109   : > { %530 = vrot.lane.b32.xlu0 %v475_v15, %s906_s11 }
 0x10a   : > { %532 = vrot.lane.b32.xlu1 %v476_v14, %s906_s11 }
 0x10d   : > { %546 = vrot.lane.b32.xlu0 %v483_v17, %s906_s11 }
 0x10e   : > { %548 = vrot.lane.b32.xlu1 %v484_v16, %s906_s11 }
 0x163   : > { %v521_v19 = vpop.permute.xlu0 %520 }
 0x164   : > { %v537_v18 = vpop.permute.xlu1 %536  ;;  %568 = vst.msk [vmem:[%s994_s10 + $0x8] sm:$0xff] %vm566_vm2, %v521_v19  ;;  %763 = vst.msk [vmem:[%s994_s10 + $0x18] sm:$0xff] %vm566_vm2, %v521_v19 }
 0x165   : > { %576 = vst.msk [vmem:[%s994_s10 + $0x88] sm:$0xff] %vm566_vm2, %v537_v18  ;;  %771 = vst.msk [vmem:[%s994_s10 + $0x98] sm:$0xff] %vm566_vm2, %v537_v18 }
 0x167   : > { %v519_v21 = vpop.permute.xlu0 %518 }
 0x168   : > { %v525_v20 = vpop.permute.xlu1 %524  ;;  %567 = vst.msk [vmem:[%s994_s10] sm:$0xff] %vm566_vm2, %v519_v21  ;;  %762 = vst.msk [vmem:[%s994_s10 + $0x10] sm:$0xff] %vm566_vm2, %v519_v21 }
 0x169   : > { %570 = vst.msk [vmem:[%s994_s10 + $0x28] sm:$0xff] %vm566_vm2, %v525_v20  ;;  %765 = vst.msk [vmem:[%s994_s10 + $0x38] sm:$0xff] %vm566_vm2, %v525_v20 }
 0x16b   : > { %v535_v23 = vpop.permute.xlu0 %534 }
 0x16c   : > { %v541_v22 = vpop.permute.xlu1 %540  ;;  %575 = vst.msk [vmem:[%s994_s10 + $0x80] sm:$0xff] %vm566_vm2, %v535_v23  ;;  %770 = vst.msk [vmem:[%s994_s10 + $0x90] sm:$0xff] %vm566_vm2, %v535_v23 }
 0x16d   : > { %578 = vst.msk [vmem:[%s994_s10 + $0xa8] sm:$0xff] %vm566_vm2, %v541_v22  ;;  %773 = vst.msk [vmem:[%s994_s10 + $0xb8] sm:$0xff] %vm566_vm2, %v541_v22 }
 0x16f   : > { %v539_v25 = vpop.permute.xlu0 %538 }
 0x170   : > { %v523_v24 = vpop.permute.xlu1 %522  ;;  %577 = vst.msk [vmem:[%s994_s10 + $0xa0] sm:$0xff] %vm566_vm2, %v539_v25  ;;  %772 = vst.msk [vmem:[%s994_s10 + $0xb0] sm:$0xff] %vm566_vm2, %v539_v25 }
 0x171   : > { %569 = vst.msk [vmem:[%s994_s10 + $0x20] sm:$0xff] %vm566_vm2, %v523_v24  ;;  %764 = vst.msk [vmem:[%s994_s10 + $0x30] sm:$0xff] %vm566_vm2, %v523_v24 }
 0x173   : > { %v527_v27 = vpop.permute.xlu0 %526 }
 0x174   : > { %v529_v26 = vpop.permute.xlu1 %528  ;;  %571 = vst.msk [vmem:[%s994_s10 + $0x40] sm:$0xff] %vm566_vm2, %v527_v27  ;;  %766 = vst.msk [vmem:[%s994_s10 + $0x50] sm:$0xff] %vm566_vm2, %v527_v27 }
 0x175   : > { %572 = vst.msk [vmem:[%s994_s10 + $0x48] sm:$0xff] %vm566_vm2, %v529_v26  ;;  %767 = vst.msk [vmem:[%s994_s10 + $0x58] sm:$0xff] %vm566_vm2, %v529_v26 }
 0x177   : > { %v543_v29 = vpop.permute.xlu0 %542 }
 0x178   : > { %v545_v28 = vpop.permute.xlu1 %544  ;;  %579 = vst.msk [vmem:[%s994_s10 + $0xc0] sm:$0xff] %vm566_vm2, %v543_v29  ;;  %774 = vst.msk [vmem:[%s994_s10 + $0xd0] sm:$0xff] %vm566_vm2, %v543_v29 }
 0x179   : > { %580 = vst.msk [vmem:[%s994_s10 + $0xc8] sm:$0xff] %vm566_vm2, %v545_v28  ;;  %775 = vst.msk [vmem:[%s994_s10 + $0xd8] sm:$0xff] %vm566_vm2, %v545_v28 }
 0x17b   : > { %v531_v31 = vpop.permute.xlu0 %530 }
 0x17c   : > { %v533_v30 = vpop.permute.xlu1 %532  ;;  %573 = vst.msk [vmem:[%s994_s10 + $0x60] sm:$0xff] %vm566_vm2, %v531_v31  ;;  %768 = vst.msk [vmem:[%s994_s10 + $0x70] sm:$0xff] %vm566_vm2, %v531_v31 }
 0x17d   : > { %574 = vst.msk [vmem:[%s994_s10 + $0x68] sm:$0xff] %vm566_vm2, %v533_v30  ;;  %769 = vst.msk [vmem:[%s994_s10 + $0x78] sm:$0xff] %vm566_vm2, %v533_v30 }
 0x17f   : > { %v547_v33 = vpop.permute.xlu0 %546 }
 0x180   : > { %v549_v32 = vpop.permute.xlu1 %548  ;;  %581 = vst.msk [vmem:[%s994_s10 + $0xe0] sm:$0xff] %vm566_vm2, %v547_v33  ;;  %776 = vst.msk [vmem:[%s994_s10 + $0xf0] sm:$0xff] %vm566_vm2, %v547_v33 }
 0x181   : > { %582 = vst.msk [vmem:[%s994_s10 + $0xe8] sm:$0xff] %vm566_vm2, %v549_v32  ;;  %777 = vst.msk [vmem:[%s994_s10 + $0xf8] sm:$0xff] %vm566_vm2, %v549_v32 }
 0x182 PF: > { %s13_s16 = sadd.s32 1, %s904_s16   ;;  %s1171_s12 = smov %s896_s14 }
 0x183   : > { %p10_p7 = scmp.ge.s32.totalorder %s13_s16, 6   ;;  %s1172_s13 = smov %s900_s15 }
 0x184   : > { %s1173_s14 = smov %s1176_s17  ;;  %s1174_s15 = smov %s1180_s18 }
 0x185   :  { %12 = sbr.rel (!%p10_p7) target bundleno = 3 (0x3), region = 63 }

</bundles_post_ra>
